<compile_context>
chip_gen: v5e
topology: v5e:2x2
jax: 0.10.0
libtpu: 0.0.40
codegen_flags: <defaults>
</compile_context>

<pallas_src>
import functools
import math

import jax
import jax.numpy as jnp
from jax.experimental import pallas as pl
from jax.experimental.pallas import tpu as pltpu


_MASK_VALUE = -0.7 * float(jnp.finfo(jnp.float32).max)


# ---------------------------------------------------------------------------
# helpers
# ---------------------------------------------------------------------------
def _vmem_capacity_bytes():
    try:
        return int(pltpu.get_tpu_info().vmem_capacity_bytes)
    except Exception:
        return 64 << 20  # conservative fallback: v7x has the smallest VMEM/TC


def _pick_tile(n, candidates):
    """Largest candidate that divides n exactly; else the full dim."""
    for c in candidates:
        if c <= n and n % c == 0:
            return c
    return n


def _matmul_tile_bytes(tm, tn, tk, in_itemsize, out_itemsize):
    # double-buffered A/B tiles + double-buffered output tile + f32 accumulator
    return (2 * (tm * tk + tk * tn) * in_itemsize
            + 2 * tm * tn * out_itemsize
            + tm * tn * 4)


def _select_matmul_tiles(M, N, K, in_itemsize, out_itemsize, budget):
    """Prefer MXU-friendly 256/512 tiles (v6e/v7x), fall back while over budget."""
    def cands(n, options):
        out = [c for c in options if c <= n and n % c == 0]
        return out or [n]

    tms = cands(M, (512, 256, 128, 64, 32, 16, 8))
    tns = cands(N, (512, 256, 128))
    tks = cands(K, (512, 256, 128))
    for tm in tms:
        for tn in tns:
            for tk in tks:
                if _matmul_tile_bytes(tm, tn, tk, in_itemsize, out_itemsize) <= budget:
                    return tm, tn, tk
    return tms[-1], tns[-1], tks[-1]


# ---------------------------------------------------------------------------
# tiled matmul kernel  (used for the fused QKV projection and wo)
# ---------------------------------------------------------------------------
def _matmul_kernel(a_ref, b_ref, o_ref, acc_ref):
    @pl.when(pl.program_id(2) == 0)
    def _():
        acc_ref[...] = jnp.zeros_like(acc_ref)

    acc_ref[...] += jnp.dot(a_ref[...], b_ref[...],
                            preferred_element_type=jnp.float32)

    @pl.when(pl.program_id(2) == pl.num_programs(2) - 1)
    def _():
        o_ref[...] = acc_ref[...].astype(o_ref.dtype)


def matmul(a, b, *, out_dtype=None):
    """a @ b with a:(M,K), b:(K,N)."""
    M, K = a.shape
    K2, N = b.shape
    assert K == K2
    out_dtype = out_dtype or a.dtype

    cap = _vmem_capacity_bytes()
    in_itemsize = jnp.dtype(a.dtype).itemsize
    out_itemsize = jnp.dtype(out_dtype).itemsize
    tm, tn, tk = _select_matmul_tiles(M, N, K, in_itemsize, out_itemsize,
                                      budget=int(cap * 0.5))
    need = _matmul_tile_bytes(tm, tn, tk, in_itemsize, out_itemsize) + (8 << 20)
    vmem_limit = int(min(max(need, 16 << 20), int(cap * 0.85)))
    grid = (M // tm, N // tn, K // tk)

    return pl.pallas_call(
        _matmul_kernel,
        out_shape=jax.ShapeDtypeStruct((M, N), out_dtype),
        grid_spec=pltpu.PrefetchScalarGridSpec(
            num_scalar_prefetch=0,
            grid=grid,
            in_specs=[
                pl.BlockSpec((tm, tk), lambda i, j, k: (i, k)),
                pl.BlockSpec((tk, tn), lambda i, j, k: (k, j)),
            ],
            out_specs=pl.BlockSpec((tm, tn), lambda i, j, k: (i, j)),
            scratch_shapes=[pltpu.VMEM((tm, tn), jnp.float32)],
        ),
        compiler_params=pltpu.CompilerParams(
            dimension_semantics=("parallel", "parallel", "arbitrary"),
            vmem_limit_bytes=vmem_limit,
        ),
    )(a, b)


# ---------------------------------------------------------------------------
# flash attention core with fused RoPE, one (batch, head, q-tile) per output
# ---------------------------------------------------------------------------
def _rope_rotate(x_f32, cos, sin):
    """Interleaved-pair rotation (matches torch.view_as_complex semantics)."""
    d = x_f32.shape[-1]
    lane = jax.lax.broadcasted_iota(jnp.int32, x_f32.shape, dimension=1)
    is_even = (lane % 2) == 0
    # partner[2j] = -x[2j+1], partner[2j+1] = x[2j]; pair-local, so the lane
    # wrap-around introduced by roll is never selected.
    x_next = pltpu.roll(x_f32, shift=d - 1, axis=1)   # x_next[i] = x[i+1]
    x_prev = pltpu.roll(x_f32, shift=1, axis=1)       # x_prev[i] = x[i-1]
    partner = jnp.where(is_even, -x_next, x_prev)
    return x_f32 * cos + partner * sin


def _flash_kernel(q_ref, k_ref, v_ref, cos_q_ref, sin_q_ref, cos_k_ref, sin_k_ref,
                  o_ref, m_sc, l_sc, acc_sc, qrot_sc,
                  *, scale, causal, tq, tkv):
    qi = pl.program_id(2)
    ki = pl.program_id(3)

    @pl.when(ki == 0)
    def _init():
        m_sc[...] = jnp.full_like(m_sc, _MASK_VALUE)
        l_sc[...] = jnp.zeros_like(l_sc)
        acc_sc[...] = jnp.zeros_like(acc_sc)
        # RoPE on the q tile once per q-tile; store back in the input dtype so
        # the MXU runs a bf16 matmul for bf16 activations.
        q = q_ref[0].astype(jnp.float32)
        qrot_sc[...] = _rope_rotate(q, cos_q_ref[...],
                                    sin_q_ref[...]).astype(qrot_sc.dtype)

    def _compute():
        k = k_ref[0].astype(jnp.float32)
        k_rot = _rope_rotate(k, cos_k_ref[...], sin_k_ref[...]).astype(k_ref.dtype)
        # scores = (q_rot @ k_rot^T) / sqrt(head_dim), f32 accumulation on MXU
        s = jax.lax.dot_general(qrot_sc[...], k_rot, (((1,), (1,)), ((), ())),
                                preferred_element_type=jnp.float32) * scale
        if causal:
            row = qi * tq + jax.lax.broadcasted_iota(jnp.int32, (tq, tkv), 0)
            col = ki * tkv + jax.lax.broadcasted_iota(jnp.int32, (tq, tkv), 1)
            s = jnp.where(col > row, _MASK_VALUE, s)

        # online softmax with deferred normalization
        m_prev = m_sc[...]
        m_new = jnp.maximum(m_prev, jnp.max(s, axis=-1, keepdims=True))
        alpha = jnp.exp(m_prev - m_new)
        p = jnp.exp(s - m_new)
        l_sc[...] = alpha * l_sc[...] + jnp.sum(p, axis=-1, keepdims=True)
        acc_sc[...] = alpha * acc_sc[...] + jnp.dot(
            p.astype(v_ref.dtype), v_ref[0], preferred_element_type=jnp.float32)
        m_sc[...] = m_new

    if causal:
        # skip kv blocks that lie entirely above the diagonal
        pl.when(ki * tkv < (qi + 1) * tq)(_compute)
    else:
        _compute()

    @pl.when(ki == pl.num_programs(3) - 1)
    def _finalize():
        o_ref[0] = (acc_sc[...] *
                    pl.reciprocal(l_sc[...], approx=True)).astype(o_ref.dtype)


def flash_attention(qkv, cos_hd, sin_hd, *, n_heads, causal):
    """qkv: (bsz, seq, 3*dim) fused projection output laid out [q | k | v],
    each head-concatenated; cos_hd/sin_hd: (seq, head_dim)."""
    bsz, seq, three_dim = qkv.shape
    dim = three_dim // 3
    head_dim = dim // n_heads
    # TODO(synk): pack multiple heads per grid step when head_dim < 128.
    assert head_dim % 128 == 0, "lane-dense head layout needs head_dim % 128 == 0"

    tq = _pick_tile(seq, (512, 256, 128, 64, 32, 16, 8))
    tkv = _pick_tile(seq, (512, 256, 128, 64, 32, 16, 8))
    grid = (bsz, n_heads, seq // tq, seq // tkv)
    kernel = functools.partial(_flash_kernel, scale=1.0 / math.sqrt(head_dim),
                               causal=causal, tq=tq, tkv=tkv)

    return pl.pallas_call(
        kernel,
        out_shape=jax.ShapeDtypeStruct((bsz, seq, dim), qkv.dtype),
        grid_spec=pltpu.PrefetchScalarGridSpec(
            num_scalar_prefetch=0,
            grid=grid,
            in_specs=[
                # q / k / v tiles sliced straight out of the fused qkv slab
                pl.BlockSpec((1, tq, head_dim),
                             lambda b, h, qi, ki: (b, qi, h)),
                pl.BlockSpec((1, tkv, head_dim),
                             lambda b, h, qi, ki: (b, ki, n_heads + h)),
                pl.BlockSpec((1, tkv, head_dim),
                             lambda b, h, qi, ki: (b, ki, 2 * n_heads + h)),
                # cos/sin for the q tile and the kv tile (shared across heads)
                pl.BlockSpec((tq, head_dim), lambda b, h, qi, ki: (qi, 0)),
                pl.BlockSpec((tq, head_dim), lambda b, h, qi, ki: (qi, 0)),
                pl.BlockSpec((tkv, head_dim), lambda b, h, qi, ki: (ki, 0)),
                pl.BlockSpec((tkv, head_dim), lambda b, h, qi, ki: (ki, 0)),
            ],
            out_specs=pl.BlockSpec((1, tq, head_dim),
                                   lambda b, h, qi, ki: (b, qi, h)),
            scratch_shapes=[
                pltpu.VMEM((tq, 1), jnp.float32),          # running max m
                pltpu.VMEM((tq, 1), jnp.float32),          # running denom l
                pltpu.VMEM((tq, head_dim), jnp.float32),   # un-normalized acc
                pltpu.VMEM((tq, head_dim), qkv.dtype),     # q after RoPE
            ],
        ),
        compiler_params=pltpu.CompilerParams(
            dimension_semantics=("parallel", "parallel", "parallel", "arbitrary")),
    )(qkv, qkv, qkv, cos_hd, sin_hd, cos_hd, sin_hd)


# ---------------------------------------------------------------------------
# full Attention.forward (default path)
# ---------------------------------------------------------------------------
def prepare_attention_weights(wq, wk, wv, wo):
    """Hoisted out of the forward: fuse QKV weights and pre-transpose wo."""
    w_qkv = jnp.concatenate([wq.T, wk.T, wv.T], axis=1)   # (dim, 3*dim)
    wo_t = wo.T                                            # (dim, dim)
    return w_qkv, wo_t


def attention_forward(x, w_qkv, wo_t, freqs_cos, freqs_sin, *, n_heads,
                      causal=True):
    """x: (bsz, seq, dim); w_qkv: (dim, 3*dim); wo_t: (dim, dim);
    freqs_cos/sin: (seq, head_dim//2) real/imag parts of freqs_cis."""
    bsz, seq, dim = x.shape

    # fused QKV projection (reads x once); reshape is free (no transpose)
    qkv = matmul(x.reshape(bsz * seq, dim), w_qkv).reshape(bsz, seq, 3 * dim)

    # per-head cos/sin, interleaved to match view_as_complex pair layout
    cos_hd = jnp.repeat(freqs_cos.astype(jnp.float32), 2, axis=-1)  # (seq, hd)
    sin_hd = jnp.repeat(freqs_sin.astype(jnp.float32), 2, axis=-1)

    # flash attention core with fused RoPE; output is already in the
    # head-concatenated (bsz, seq, dim) layout the wo projection expects.
    attn = flash_attention(qkv, cos_hd, sin_hd, n_heads=n_heads, causal=causal)

    out = matmul(attn.reshape(bsz * seq, dim), wo_t)
    return out.reshape(bsz, seq, dim)


# ---------------------------------------------------------------------------
# pure-JAX reference (mirrors the PyTorch module exactly)
# ---------------------------------------------------------------------------
def attention_ref(x, wq, wk, wv, wo, freqs_cos, freqs_sin, mask, *, n_heads):
    bsz, seq, dim = x.shape
    head_dim = dim // n_heads
    xq = x @ wq.T
    xk = x @ wk.T
    xv = x @ wv.T
    xq = xq.reshape(bsz, seq, n_heads, head_dim)
    xk = xk.reshape(bsz, seq, n_heads, head_dim)
    xv = xv.reshape(bsz, seq, n_heads, head_dim)

    def rope(t):
        tf = t.astype(jnp.float32).reshape(bsz, seq, n_heads, head_dim // 2, 2)
        tr, ti = tf[..., 0], tf[..., 1]
        c = freqs_cos[None, :, None, :]
        s = freqs_sin[None, :, None, :]
        out_r = tr * c - ti * s
        out_i = tr * s + ti * c
        return jnp.stack([out_r, out_i], axis=-1).reshape(
            bsz, seq, n_heads, head_dim).astype(t.dtype)

    xq, xk = rope(xq), rope(xk)
    q = xq.transpose(0, 2, 1, 3)
    k = xk.transpose(0, 2, 1, 3)
    v = xv.transpose(0, 2, 1, 3)
    scores = jnp.einsum('bhqd,bhkd->bhqk', q, k) / math.sqrt(head_dim)
    if mask is not None:
        scores = scores + mask[None, None]
    p = jax.nn.softmax(scores.astype(jnp.float32), axis=-1).astype(q.dtype)
    o = jnp.einsum('bhqk,bhkd->bhqd', p, v)
    o = o.transpose(0, 2, 1, 3).reshape(bsz, seq, n_heads * head_dim)
    return o @ wo.T


# ---------------------------------------------------------------------------
if __name__ == "__main__":
    key = jax.random.PRNGKey(0)
    bsz, seq = 2, 16
    dim, n_heads = 256, 2          # head_dim = 128 (standard Llama head width)
    head_dim = dim // n_heads

    ks = jax.random.split(key, 5)
    x = jax.random.normal(ks[0], (bsz, seq, dim), jnp.float32)
    w_scale = 0.05
    wq = w_scale * jax.random.normal(ks[1], (dim, dim), jnp.float32)
    wk = w_scale * jax.random.normal(ks[2], (dim, dim), jnp.float32)
    wv = w_scale * jax.random.normal(ks[3], (dim, dim), jnp.float32)
    wo = w_scale * jax.random.normal(ks[4], (dim, dim), jnp.float32)

    # freqs_cis equivalent (precompute_freqs_cis), passed as cos/sin parts.
    theta = 10000.0
    inv_freq = 1.0 / (theta ** (jnp.arange(0, head_dim, 2, dtype=jnp.float32)
                                / head_dim))
    t = jnp.arange(seq, dtype=jnp.float32)
    ang = jnp.outer(t, inv_freq)                      # (seq, head_dim//2)
    freqs_cos, freqs_sin = jnp.cos(ang), jnp.sin(ang)

    # weights fused/transposed once, outside the forward (hoisted)
    w_qkv, wo_t = prepare_attention_weights(wq, wk, wv, wo)

    out = attention_forward(x, w_qkv, wo_t, freqs_cos, freqs_sin,
                            n_heads=n_heads, causal=True)
    out = jax.block_until_ready(out)

    # reference uses the explicit causal mask the Transformer would pass in
    row = jnp.arange(seq)
    mask = jnp.where(row[None, :] > row[:, None], -1e30, 0.0).astype(jnp.float32)
    ref = attention_ref(x, wq, wk, wv, wo, freqs_cos, freqs_sin, mask,
                        n_heads=n_heads)

    assert out.shape == (bsz, seq, dim)
    max_err = float(jnp.max(jnp.abs(out - ref)))
    assert jnp.allclose(out, ref, atol=2e-2, rtol=2e-2), f"max abs err {max_err}"

    print("KERNEL_OK")
</pallas_src>

<mosaic_0001>
module attributes {stable_mosaic.version = 11 : i64} {
  func.func @_matmul_kernel(%arg0: i32, %arg1: i32, %arg2: i32, %arg3: memref<32x256xf32, #tpu.memory_space<vmem>>, %arg4: memref<256x256xf32, #tpu.memory_space<vmem>>, %arg5: memref<32x256xf32, #tpu.memory_space<vmem>>, %arg6: memref<32x256xf32, #tpu.memory_space<vmem>>) attributes {dimension_semantics = [#tpu.dimension_semantics<parallel>, #tpu.dimension_semantics<parallel>, #tpu.dimension_semantics<arbitrary>], iteration_bounds = array<i64: 1, 3, 1>, scalar_prefetch = 0 : i64, scratch_operands = 1 : i64, tpu.core_type = #tpu.core_type<tc>, window_params = [{transform_indices = @transform_0, window_bounds = array<i64: 32, 256>}, {transform_indices = @transform_1, window_bounds = array<i64: 256, 256>}, {transform_indices = @transform_2, window_bounds = array<i64: 32, 256>}]} {
    %c0_i32 = arith.constant 0 : i32
    %0 = arith.cmpi eq, %arg2, %c0_i32 : i32
    %1 = arith.extui %0 : i1 to i32
    %c0_i32_0 = arith.constant 0 : i32
    %2 = arith.cmpi ne, %1, %c0_i32_0 : i32
    scf.if %2 {
      %cst_10 = arith.constant 0.000000e+00 : f32
      %12 = vector.broadcast %cst_10 : f32 to vector<32x256xf32>
      %c0_11 = arith.constant 0 : index
      %c0_12 = arith.constant 0 : index
      %13 = vector.load %arg6[%c0_11, %c0_12] : memref<32x256xf32, #tpu.memory_space<vmem>>, vector<32x256xf32>
      tpu.vector_store %arg6[%c0_11, %c0_12], %12 {strides = array<i32>} : memref<32x256xf32, #tpu.memory_space<vmem>>, vector<32x256xf32>,
    } else {
    }
    %c0 = arith.constant 0 : index
    %c0_1 = arith.constant 0 : index
    %3 = vector.load %arg6[%c0, %c0_1] : memref<32x256xf32, #tpu.memory_space<vmem>>, vector<32x256xf32>
    %c0_2 = arith.constant 0 : index
    %c0_3 = arith.constant 0 : index
    %4 = vector.load %arg3[%c0_2, %c0_3] : memref<32x256xf32, #tpu.memory_space<vmem>>, vector<32x256xf32>
    %c0_4 = arith.constant 0 : index
    %c0_5 = arith.constant 0 : index
    %5 = vector.load %arg4[%c0_4, %c0_5] : memref<256x256xf32, #tpu.memory_space<vmem>>, vector<256x256xf32>
    %cst = arith.constant dense<0.000000e+00> : vector<32x256xf32>
    %6 = tpu.matmul %4, %5, %cst {dimension_numbers = #tpu.dot_dimension_numbers<[1], [0], [0], [1], [0, 0, 1, 1], [], []>} : vector<32x256xf32>, vector<256x256xf32>, vector<32x256xf32> -> vector<32x256xf32>
    %7 = arith.addf %3, %6 : vector<32x256xf32>
    %c0_6 = arith.constant 0 : index
    %c0_7 = arith.constant 0 : index
    %8 = vector.load %arg6[%c0_6, %c0_7] : memref<32x256xf32, #tpu.memory_space<vmem>>, vector<32x256xf32>
    tpu.vector_store %arg6[%c0_6, %c0_7], %7 {strides = array<i32>} : memref<32x256xf32, #tpu.memory_space<vmem>>, vector<32x256xf32>,
    %c0_i32_8 = arith.constant 0 : i32
    %9 = arith.cmpi eq, %arg2, %c0_i32_8 : i32
    %10 = arith.extui %9 : i1 to i32
    %c0_i32_9 = arith.constant 0 : i32
    %11 = arith.cmpi ne, %10, %c0_i32_9 : i32
    scf.if %11 {
      %c0_10 = arith.constant 0 : index
      %c0_11 = arith.constant 0 : index
      %12 = vector.load %arg6[%c0_10, %c0_11] : memref<32x256xf32, #tpu.memory_space<vmem>>, vector<32x256xf32>
      %c0_12 = arith.constant 0 : index
      %c0_13 = arith.constant 0 : index
      %13 = vector.load %arg5[%c0_12, %c0_13] : memref<32x256xf32, #tpu.memory_space<vmem>>, vector<32x256xf32>
      tpu.vector_store %arg5[%c0_12, %c0_13], %12 {strides = array<i32>} : memref<32x256xf32, #tpu.memory_space<vmem>>, vector<32x256xf32>,
    } else {
    }
    return
  }
  func.func @transform_0(%arg0: i32, %arg1: i32, %arg2: i32) -> (i32, i32) {
    %c0_i32 = arith.constant 0 : i32
    return %arg0, %arg2 : i32, i32
  }
  func.func @transform_1(%arg0: i32, %arg1: i32, %arg2: i32) -> (i32, i32) {
    %c0_i32 = arith.constant 0 : i32
    return %arg2, %arg1 : i32, i32
  }
  func.func @transform_2(%arg0: i32, %arg1: i32, %arg2: i32) -> (i32, i32) {
    %c0_i32 = arith.constant 0 : i32
    return %arg0, %arg1 : i32, i32
  }
}

</mosaic_0001>

<bundles_post_ra>
// kernel: tpu_custom_call.1
= control target key start
LH: loop header
LB: loop body
LE: loop exit
PB: predicated region body
PF: predicated region fallthrough
CT: control target
= control target key end

     0   :  { %7 = vsyncpa [#allocation4], 0  ;;  %s1093_s0 = inlined_call_operand.hbm [shape: f32[32,256], index: 0, kind: input, shape index: {}]   ;;  %s1094_s1 = inlined_call_operand.hbm [shape: f32[256,768], index: 1, kind: input, shape index: {}]   ;;  %s1095_s2 = inlined_call_operand.hbm [shape: f32[32,768], index: 2, kind: output, shape index: {}]  }
   0x1   :  { %8 = vsyncpa [#allocation7], 0 }
   0x2   :  { %10 = vsyncpa [#allocation7 + $0x1], 0 }
   0x3   :  { %11 = vsyncpa [#allocation5], 0 }
   0x4   :  { %13 = vsyncpa [#allocation5 + $0x1], 0  ;;  %s863_s9 = smov 0   ;;  %s865_s10 = smov 0  }
   0x5   :  { %s867_s11 = smov 0   ;;  %s869_s12 = smov 0  }
   0x6   :  { %s871_s13 = smov 0   ;;  %s873_s14 = smov 0  }
   0x7 LB: > { %s595_s15 = sadd.s32 4294967295, %s839_s14   ;;  %s596_s16 = sadd.s32 4294967294, %s839_s14   ;;  %s839_s14 = sphi %s873_s14, %s19_s14   ;;  %s835_s13 = sphi %s871_s13, %s1109_s13   ;;  %s831_s12 = sphi %s869_s12, %s1108_s12   ;;  %s827_s11 = sphi %s867_s11, %s1107_s11   ;;  %s823_s10 = sphi %s865_s10, %s1106_s10   ;;  %s819_s9 = sphi %s863_s9, %s1105_s9  }
   0x8   : > { %p88_p0 = scmp.ne.s32.totalorder %s823_s10, %s819_s9  ;;  %p897_p1 = scmp.eq.s32.totalorder %s595_s15, 0 }
   0x9   : > { %p901_p2 = scmp.eq.s32.totalorder %s595_s15, 2  ;;  %p120_p3 = scmp.eq.s32.totalorder %s596_s16, 2 }
   0xa   : > { %p907_p4 = por %p897_p1, %p88_p0  ;;  %p597_p5 = scmp.ge.s32.totalorder %s839_s14, 1 }
   0xb   : > { %p912_p6 = por %p120_p3, %p88_p0  ;;  %p127_p7 = scmp.lt.s32.totalorder %s839_s14, 4 }
   0xc   : > { %s144_s23 = sshll.u32 %s1093_s0, 4  ;;  %s841_s25 = smov [#allocation3]   ;;  %s145_s23 = int_to_ptr.hbm [resolvable:$true] %s144_s23 }
   0xd   : > { %p920_p8 = pnand %p597_p5, %p127_p7  ;;  %s146_s26 = sshll.u32 %s841_s25, 4  ;;  %s147_s26 = int_to_ptr.vmem [resolvable:$true] %s146_s26 }
   0xe   : > { %s1096_s27 = smov 256   ;;  %s843_s28 = smov 16  }
   0xf   : > { %p622_p9 = pneg %p920_p8  ;;  %s34_s29 = sadd.s32 1, %s835_s13 }
  0x10   : > { %p36_p11 = scmp.ge.s32.totalorder %s34_s29, 3  ;;  %s75_s30 = sadd.s32 1, %s827_s11 }
  0x11   : > { %p623_p10 = pnand %p622_p9, %p897_p1  ;;  %p82_p12 = scmp.ne.s32.totalorder %s827_s11, %s823_s10 }
  0x12   : > { %p83_p13 = scmp.eq.s32.totalorder %s839_s14, 0  ;;  %s1111_s29 = smov (%p36_p11, %s34_s29), 0 }
  0x13   : > { %625 = dma.hbm_to_vmem [thread:$0]  (!%p623_p10), %s145_s23, 1024, %s147_s26, [#allocation4], %s1096_s27, %s1096_s27, %s843_s28  }
  0x14   : > { %p938_p0 = por %p83_p13, %p82_p12  ;;  %p944_p3 = por %p901_p2, %p82_p12 }
  0x15   : > { %s71_s5 = ssub.s32 %s835_s13, %s1111_s29  ;;  %p635_p5 = scmp.lt.s32.totalorder %s839_s14, 3 }
  0x16   : > { %p73_p7 = scmp.eq.s32.totalorder %s71_s5, 0  ;;  %s160_s6 = sand.u32 1, %s827_s11  }
  0x17   : > { %s600_s7 = sshll.u32 %s160_s6, 9  ;;  %s612_s15 = sshll.u32 %s835_s13, 4 }
  0x18   : > { %s953_s8 = scalar_select %p73_p7, %s827_s11, %s75_s30  }
  0x19   : > { %s172_s22 = scalar_lea.hbm %s1094_s1, %s612_s15  ;;  %s164_s23 = scalar_lea.vmem [#allocation6], %s600_s7 }
  0x1a   : > { %s175_s25 = sshll.u32 %s164_s23, 4  ;;  %s173_s18 = sshll.u32 %s172_s22, 4  ;;  %s176_s25 = int_to_ptr.vmem [resolvable:$true] %s175_s25  ;;  %s174_s18 = int_to_ptr.hbm [resolvable:$true] %s173_s18 }
  0x1b   : > { %p627_p2 = pnand %p635_p5, %p938_p0  ;;  %s161_s26 = scalar_lea.sflag [#allocation7], %s160_s6 }
  0x1c   : > { %s844_s27 = smov 768   ;;  %s1104_s5 = smov 256  }
  0x1d   : > { %629 = dma.hbm_to_vmem [thread:$0]  (!%p627_p2), %s174_s18, 8192, %s176_s25, %s161_s26, %s844_s27, %s1104_s5, %s843_s28  }
  0x1e   : > { %187 = sbr.rel (%p920_p8) target bundleno = 236 (0xec), region = 28 }
  0x23   : > { %806 = dma.done.wait (%p897_p1), [#allocation4], 1024  }
  0x24   : > { %808 = vsyncadd (%p897_p1), [#allocation4], 4294966272  ;;  %s970_s30 = sand.u32 1, %s823_s10  }
  0x25   : > { %s605_s3 = sshll.u32 %s970_s30, 9  ;;  %s195_s6 = scalar_lea.sflag [#allocation7], %s970_s30 }
  0x26   : > { %s974_s7 = scalar_lea.vmem [#allocation6], %s605_s3 }
  0x27   : > { %810 = dma.done.wait (%p907_p4), %s195_s6, 8192  }
  0x28   : > { %812 = vsyncadd (%p907_p4), %s195_s6, 4294959104  ;;  %v285_v0 = vld [vmem:[%s974_s7 + $0xf8] sm:$0xff]  ;;  %v283_v2 = vld [vmem:[%s974_s7 + $0xe8] sm:$0xff]  ;;  %s606_s17 = sshll.u32 %s970_s30, 6  ;;  %s613_s24 = sshll.u32 %s831_s12, 4 }
  0x29   : > { %v317_v1 = vld [vmem:[%s974_s7 + $0x1f8] sm:$0xff]  ;;  %376 = vmatpush.msra.mxu2 %v285_v0  ;;  %v315_v3 = vld [vmem:[%s974_s7 + $0x1e8] sm:$0xff]  ;;  %v284_v6 = vld [vmem:[%s974_s7 + $0xf0] sm:$0xff]  ;;  %s1045_s19 = scalar_lea.vmem [#allocation8], %s606_s17  ;;  %s484_s15 = scalar_lea.hbm %s1095_s2, %s613_s24 }
  0x2a   : > { %405 = vmatpush.msra.mxu3 %v317_v1  ;;  %v281_v4 = vld [vmem:[%s974_s7 + $0xd8] sm:$0xff]  ;;  %v316_v7 = vld [vmem:[%s974_s7 + $0x1f0] sm:$0xff]  ;;  %v282_v8 = vld [vmem:[%s974_s7 + $0xe0] sm:$0xff]  ;;  %318 = vmatpush.msra.mxu0 %v284_v6  ;;  %s485_s16 = sshll.u32 %s1045_s19, 4  ;;  %s487_s21 = sshll.u32 %s484_s15, 4  ;;  %s486_s16 = int_to_ptr.vmem [resolvable:$true] %s485_s16  ;;  %s488_s21 = int_to_ptr.hbm [resolvable:$true] %s487_s21 }
  0x2b   : > { %v313_v5 = vld [vmem:[%s974_s7 + $0x1d8] sm:$0xff]  ;;  %377 = vmatpush.msra.mxu2 %v283_v2  ;;  %v314_v9 = vld [vmem:[%s974_s7 + $0x1e0] sm:$0xff]  ;;  %347 = vmatpush.msra.mxu1 %v316_v7  ;;  %v279_v10 = vld [vmem:[%s974_s7 + $0xc8] sm:$0xff]  ;;  %s470_s12 = scalar_lea.sflag [#allocation5], %s970_s30  ;;  %s767_s22 = sshra.s32 %s488_s21, 4  ;;  %s768_s22 = int_to_ptr.hbm [resolvable:$true] %s767_s22 }
  0x2c   : > { %406 = vmatpush.msra.mxu3 %v315_v3  ;;  %v311_v11 = vld [vmem:[%s974_s7 + $0x1c8] sm:$0xff]  ;;  %v280_v12 = vld [vmem:[%s974_s7 + $0xd0] sm:$0xff]  ;;  %319 = vmatpush.msra.mxu0 %v282_v8  ;;  %v277_v14 = vld [vmem:[%s974_s7 + $0xb8] sm:$0xff]  ;;  %s769_s23 = scalar_lea.hbm %s768_s22, 64  ;;  %s773_s26 = scalar_lea.hbm %s1095_s2, 192 }
  0x2d   : > { %378 = vmatpush.msra.mxu2 %v281_v4  ;;  %v312_v13 = vld [vmem:[%s974_s7 + $0x1d0] sm:$0xff]  ;;  %348 = vmatpush.msra.mxu1 %v314_v9  ;;  %v309_v15 = vld [vmem:[%s974_s7 + $0x1b8] sm:$0xff]  ;;  %v278_v16 = vld [vmem:[%s974_s7 + $0xc0] sm:$0xff]  ;;  %p770_p1 = scmp.ne.s32.totalorder %s768_s22, %s769_s23  ;;  %p774_p9 = scmp.lt.s32.totalorder %s768_s22, %s1095_s2 }
  0x2e   : > { %407 = vmatpush.msra.mxu3 %v313_v5  ;;  %v310_v17 = vld [vmem:[%s974_s7 + $0x1c0] sm:$0xff]  ;;  %320 = vmatpush.msra.mxu0 %v280_v12  ;;  %v275_v18 = vld [vmem:[%s974_s7 + $0xa8] sm:$0xff]  ;;  %v276_v20 = vld [vmem:[%s974_s7 + $0xb0] sm:$0xff]  ;;  %p775_p10 = scmp.lt.s32.totalorder %s773_s26, %s769_s23 }
  0x2f   : > { %379 = vmatpush.msra.mxu2 %v279_v10  ;;  %349 = vmatpush.msra.mxu1 %v312_v13  ;;  %v307_v19 = vld [vmem:[%s974_s7 + $0x1a8] sm:$0xff]  ;;  %v308_v21 = vld [vmem:[%s974_s7 + $0x1b0] sm:$0xff]  ;;  %v273_v22 = vld [vmem:[%s974_s7 + $0x98] sm:$0xff]  ;;  %p771_p4 = pnand %p770_p1, %p944_p3 }
  0x30   : > { %408 = vmatpush.msra.mxu3 %v311_v11  ;;  %321 = vmatpush.msra.mxu0 %v278_v16  ;;  %v305_v23 = vld [vmem:[%s974_s7 + $0x198] sm:$0xff]  ;;  %v274_v24 = vld [vmem:[%s974_s7 + $0xa0] sm:$0xff]  ;;  %v271_v26 = vld [vmem:[%s974_s7 + $0x88] sm:$0xff]  ;;  %p776_p11 = por %p775_p10, %p774_p9 }
  0x31   : > { %380 = vmatpush.msra.mxu2 %v277_v14  ;;  %350 = vmatpush.msra.mxu1 %v310_v17  ;;  %v306_v25 = vld [vmem:[%s974_s7 + $0x1a0] sm:$0xff]  ;;  %v303_v27 = vld [vmem:[%s974_s7 + $0x188] sm:$0xff]  ;;  %v272_v28 = vld [vmem:[%s974_s7 + $0x90] sm:$0xff]  ;;  %p772_p8 = pneg %p771_p4 }
  0x32   : > { %409 = vmatpush.msra.mxu3 %v309_v15  ;;  %322 = vmatpush.msra.mxu0 %v276_v20  ;;  %v304_v29 = vld [vmem:[%s974_s7 + $0x190] sm:$0xff]  ;;  %v269_v30 = vld [vmem:[%s974_s7 + $0x78] sm:$0xff]  ;;  %v270_v32 = vld [vmem:[%s974_s7 + $0x80] sm:$0xff] }
  0x33   : > { %381 = vmatpush.msra.mxu2 %v275_v18  ;;  %351 = vmatpush.msra.mxu1 %v308_v21  ;;  %v301_v31 = vld [vmem:[%s974_s7 + $0x178] sm:$0xff]  ;;  %v302_v33 = vld [vmem:[%s974_s7 + $0x180] sm:$0xff]  ;;  %v267_v34 = vld [vmem:[%s974_s7 + $0x68] sm:$0xff]  ;;  %p777_p12 = pnand %p776_p11, %p772_p8 }
  0x34   : > { %410 = vmatpush.msra.mxu3 %v307_v19  ;;  %323 = vmatpush.msra.mxu0 %v274_v24  ;;  %v299_v35 = vld [vmem:[%s974_s7 + $0x168] sm:$0xff]  ;;  %v268_v36 = vld [vmem:[%s974_s7 + $0x70] sm:$0xff]  ;;  %v265_v38 = vld [vmem:[%s974_s7 + $0x58] sm:$0xff] }
  0x35   : > { %382 = vmatpush.msra.mxu2 %v273_v22  ;;  %352 = vmatpush.msra.mxu1 %v306_v25  ;;  %v300_v37 = vld [vmem:[%s974_s7 + $0x170] sm:$0xff]  ;;  %v297_v39 = vld [vmem:[%s974_s7 + $0x158] sm:$0xff]  ;;  %v266_v40 = vld [vmem:[%s974_s7 + $0x60] sm:$0xff] }
  0x36   : > { %411 = vmatpush.msra.mxu3 %v305_v23  ;;  %324 = vmatpush.msra.mxu0 %v272_v28  ;;  %v298_v41 = vld [vmem:[%s974_s7 + $0x160] sm:$0xff]  ;;  %v263_v42 = vld [vmem:[%s974_s7 + $0x48] sm:$0xff]  ;;  %v264_v44 = vld [vmem:[%s974_s7 + $0x50] sm:$0xff] }
  0x37   : > { %383 = vmatpush.msra.mxu2 %v271_v26  ;;  %353 = vmatpush.msra.mxu1 %v304_v29  ;;  %v295_v43 = vld [vmem:[%s974_s7 + $0x148] sm:$0xff]  ;;  %v296_v45 = vld [vmem:[%s974_s7 + $0x150] sm:$0xff]  ;;  %v261_v46 = vld [vmem:[%s974_s7 + $0x38] sm:$0xff] }
  0x38   : > { %412 = vmatpush.msra.mxu3 %v303_v27  ;;  %325 = vmatpush.msra.mxu0 %v270_v32  ;;  %v293_v47 = vld [vmem:[%s974_s7 + $0x138] sm:$0xff]  ;;  %v262_v48 = vld [vmem:[%s974_s7 + $0x40] sm:$0xff]  ;;  %v259_v50 = vld [vmem:[%s974_s7 + $0x28] sm:$0xff] }
  0x39   : > { %384 = vmatpush.msra.mxu2 %v269_v30  ;;  %354 = vmatpush.msra.mxu1 %v302_v33  ;;  %v294_v49 = vld [vmem:[%s974_s7 + $0x140] sm:$0xff]  ;;  %v291_v51 = vld [vmem:[%s974_s7 + $0x128] sm:$0xff]  ;;  %v260_v52 = vld [vmem:[%s974_s7 + $0x30] sm:$0xff] }
  0x3a   : > { %413 = vmatpush.msra.mxu3 %v301_v31  ;;  %326 = vmatpush.msra.mxu0 %v268_v36  ;;  %v292_v53 = vld [vmem:[%s974_s7 + $0x130] sm:$0xff]  ;;  %v257_v54 = vld [vmem:[%s974_s7 + $0x18] sm:$0xff]  ;;  %v258_v56 = vld [vmem:[%s974_s7 + $0x20] sm:$0xff] }
  0x3b   : > { %385 = vmatpush.msra.mxu2 %v267_v34  ;;  %355 = vmatpush.msra.mxu1 %v300_v37  ;;  %v289_v55 = vld [vmem:[%s974_s7 + $0x118] sm:$0xff]  ;;  %v290_v57 = vld [vmem:[%s974_s7 + $0x120] sm:$0xff]  ;;  %v255_v58 = vld [vmem:[%s974_s7 + $0x8] sm:$0xff] }
  0x3c   : > { %414 = vmatpush.msra.mxu3 %v299_v35  ;;  %327 = vmatpush.msra.mxu0 %v266_v40  ;;  %v287_v59 = vld [vmem:[%s974_s7 + $0x108] sm:$0xff]  ;;  %v246_v60 = vld [vmem:[#allocation3] sm:$0xff]  ;;  %v256_v62 = vld [vmem:[%s974_s7 + $0x10] sm:$0xff] }
  0x3d   : > { %386 = vmatpush.msra.mxu2 %v265_v38  ;;  %356 = vmatpush.msra.mxu1 %v298_v41  ;;  %v247_v61 = vld [vmem:[#allocation3 + $0x8] sm:$0xff]  ;;  %v288_v63 = vld [vmem:[%s974_s7 + $0x110] sm:$0xff]  ;;  %v254_v0 = vld [vmem:[%s974_s7] sm:$0xff] }
  0x3e   : > { %415 = vmatpush.msra.mxu3 %v297_v39  ;;  %328 = vmatpush.msra.mxu0 %v264_v44  ;;  %v286_v1 = vld [vmem:[%s974_s7 + $0x100] sm:$0xff]  ;;  %v248_v2 = vld [vmem:[#allocation3 + $0x10] sm:$0xff]  ;;  %v249_v3 = vld [vmem:[#allocation3 + $0x18] sm:$0xff] }
  0x3f   : > { %387 = vmatpush.msra.mxu2 %v263_v42  ;;  %357 = vmatpush.msra.mxu1 %v296_v45  ;;  %v250_v4 = vld [vmem:[#allocation3 + $0x20] sm:$0xff]  ;;  %v251_v5 = vld [vmem:[#allocation3 + $0x28] sm:$0xff]  ;;  %v252_v6 = vld [vmem:[#allocation3 + $0x30] sm:$0xff] }
  0x40   : > { %416 = vmatpush.msra.mxu3 %v295_v43  ;;  %329 = vmatpush.msra.mxu0 %v262_v48  ;;  %v253_v7 = vld [vmem:[#allocation3 + $0x38] sm:$0xff] }
  0x41   : > { %388 = vmatpush.msra.mxu2 %v261_v46  ;;  %358 = vmatpush.msra.mxu1 %v294_v49 }
  0x42   : > { %417 = vmatpush.msra.mxu3 %v293_v47  ;;  %330 = vmatpush.msra.mxu0 %v260_v52 }
  0x43   : > { %389 = vmatpush.msra.mxu2 %v259_v50  ;;  %359 = vmatpush.msra.mxu1 %v292_v53 }
  0x44   : > { %418 = vmatpush.msra.mxu3 %v291_v51  ;;  %331 = vmatpush.msra.mxu0 %v258_v56 }
  0x45   : > { %390 = vmatpush.msra.mxu2 %v257_v54  ;;  %360 = vmatpush.msra.mxu1 %v290_v57 }
  0x46   : > { %419 = vmatpush.msra.mxu3 %v289_v55  ;;  %332 = vmatpush.msra.mxu0 %v256_v62 }
  0x47   : > { %391 = vmatpush.msra.mxu2 %v255_v58  ;;  %361 = vmatpush.msra.mxu1 %v288_v63 }
  0x48   : > { %420 = vmatpush.msra.mxu3 %v287_v59  ;;  %392 = vmatmul.f32.vlgmr.msra.gmra.mxu2 %v246_v60 }
  0x49   : > { %421 = vmatmul.f32.vlgmr.msra.gmra.mxu3 %v247_v61  ;;  %333 = vmatpush.msra.mxu0 %v254_v0 }
  0x4a   : > { %362 = vmatpush.msra.mxu1 %v286_v1  ;;  %334 = vmatmul.f32.vlgmr.msra.gmra.mxu0 %v246_v60 }
  0x4b   : > { %363 = vmatmul.f32.vlgmr.msra.gmra.mxu1 %v247_v61 }
  0x50   : > { %395 = vmatmul.f32.gmra.mxu2 %v248_v2 }
  0x51   : > { %424 = vmatmul.f32.gmra.mxu3 %v249_v3 }
  0x52   : > { %337 = vmatmul.f32.gmra.mxu0 %v248_v2 }
  0x53   : > { %366 = vmatmul.f32.gmra.mxu1 %v249_v3 }
  0x58   : > { %398 = vmatmul.f32.gmra.mxu2 %v250_v4 }
  0x59   : > { %427 = vmatmul.f32.gmra.mxu3 %v251_v5 }
  0x5a   : > { %340 = vmatmul.f32.gmra.mxu0 %v250_v4 }
  0x5b   : > { %369 = vmatmul.f32.gmra.mxu1 %v251_v5 }
  0x60   : > { %401 = vmatmul.f32.gmra.mxu2 %v252_v6 }
  0x61   : > { %430 = vmatmul.f32.gmra.mxu3 %v253_v7 }
  0x62   : > { %343 = vmatmul.f32.gmra.mxu0 %v252_v6 }
  0x63   : > { %372 = vmatmul.f32.gmra.mxu1 %v253_v7 }
  0xc7   : > { %v335_v8 = vpop.f32.mrf.mxu0 }
  0xc8   : > { %v364_v9 = vpop.f32.mrf.mxu1 }
  0xc9   : > { %v365_v10 = vadd.f32 %v364_v9, %v335_v8 }
  0xcb   : > { %v393_v11 = vpop.f32.mrf.mxu2  ;;  %461 = vst [vmem:[%s1045_s19] sm:$0xff] %v365_v10 }
  0xcc   : > { %v422_v12 = vpop.f32.mrf.mxu3 }
  0xcd   : > { %v423_v13 = vadd.f32 %v422_v12, %v393_v11 }
  0xcf   : > { %462 = vst [vmem:[%s1045_s19 + $0x8] sm:$0xff] %v423_v13  ;;  %v338_v14 = vpop.f32.mrf.mxu0 }
  0xd0   : > { %v367_v15 = vpop.f32.mrf.mxu1 }
  0xd1   : > { %v368_v16 = vadd.f32 %v367_v15, %v338_v14 }
  0xd3   : > { %v396_v17 = vpop.f32.mrf.mxu2  ;;  %463 = vst [vmem:[%s1045_s19 + $0x10] sm:$0xff] %v368_v16 }
  0xd4   : > { %v425_v18 = vpop.f32.mrf.mxu3 }
  0xd5   : > { %v426_v19 = vadd.f32 %v425_v18, %v396_v17 }
  0xd7   : > { %464 = vst [vmem:[%s1045_s19 + $0x18] sm:$0xff] %v426_v19  ;;  %v341_v20 = vpop.f32.mrf.mxu0 }
  0xd8   : > { %v370_v21 = vpop.f32.mrf.mxu1 }
  0xd9   : > { %v371_v22 = vadd.f32 %v370_v21, %v341_v20 }
  0xdb   : > { %v399_v23 = vpop.f32.mrf.mxu2  ;;  %465 = vst [vmem:[%s1045_s19 + $0x20] sm:$0xff] %v371_v22 }
  0xdc   : > { %v428_v24 = vpop.f32.mrf.mxu3 }
  0xdd   : > { %v429_v25 = vadd.f32 %v428_v24, %v399_v23 }
  0xdf   : > { %466 = vst [vmem:[%s1045_s19 + $0x28] sm:$0xff] %v429_v25  ;;  %v344_v26 = vpop.f32.mrf.mxu0 }
  0xe0   : > { %v373_v27 = vpop.f32.mrf.mxu1 }
  0xe1   : > { %v374_v28 = vadd.f32 %v373_v27, %v344_v26 }
  0xe3   : > { %v402_v29 = vpop.f32.mrf.mxu2  ;;  %467 = vst [vmem:[%s1045_s19 + $0x30] sm:$0xff] %v374_v28 }
  0xe4   : > { %v431_v30 = vpop.f32.mrf.mxu3 }
  0xe5   : > { %v432_v31 = vadd.f32 %v431_v30, %v402_v29 }
  0xe7   : > { %468 = vst [vmem:[%s1045_s19 + $0x38] sm:$0xff] %v432_v31 }
  0xe8   : > { %780 = shalt.err (!%p777_p12)
}
  0xe9   : > { %s845_s30 = smov 256   ;;  %s846_s6 = smov 768  }
  0xea   : > { %s847_s7 = smov 16  }
  0xeb   : > { %620 = dma.vmem_to_hbm [thread:$0]  (%p944_p3), %s486_s16, 1024, %s488_s21, %s470_s12, %s845_s30, %s846_s6, %s847_s7  }
  0xec PF: > { %p637_p13 = scmp.ge.s32.totalorder %s839_s14, 2  ;;  %s502_s17 = sand.u32 1, %s819_s9  }
  0xed   : > { %s503_s19 = scalar_lea.sflag [#allocation5], %s502_s17 }
  0xee   : > { %p631_p0 = pnand %p637_p13, %p912_p6 }
  0xf0   : > { %p632_p5 = pneg %p631_p0 }
  0xf2   : > { %814 = dma.done.wait (%p632_p5), %s503_s19, 1024  }
  0xf3   : > { %816 = vsyncadd (%p632_p5), %s503_s19, 4294966272  ;;  %s19_s14 = sadd.s32 1, %s839_s14   ;;  %s1105_s9 = smov %s823_s10 }
  0xf4   : > { %p16_p7 = scmp.ge.s32.totalorder %s19_s14, 5   ;;  %s1106_s10 = smov %s827_s11 }
  0xf5   : > { %s1107_s11 = smov %s953_s8  ;;  %s1108_s12 = smov %s835_s13 }
  0xf6   : > { %s1109_s13 = smov %s1111_s29  ;;  %18 = sbr.rel (!%p16_p7) target bundleno = 7 (0x7), region = 87 }
  0xfb   :  { %509 = vsyncpa [#allocation4], 1 }
  0xfc   :  { %511 = vsyncpa [#allocation4 + $0x1], 1 }
  0xfd   :  { %512 = vsyncpa [#allocation7], 1 }
  0xfe   :  { %514 = vsyncpa [#allocation7 + $0x1], 1 }
  0xff   :  { %515 = vsyncpa [#allocation5], 1 }
 0x100   :  { %517 = vsyncpa [#allocation5 + $0x1], 1 }

</bundles_post_ra>
